<compile_context>
chip_gen: v7x
topology: tpu7x:2x2x1
jax: 0.10.0
libtpu: 0.0.40
codegen_flags: <defaults>
</compile_context>

<pallas_src>
import jax
import jax.numpy as jnp
import numpy as np
from jax.experimental import pallas as pl
from jax.experimental.pallas import tpu as pltpu


def relunet_kernel(x_ref, w1_ref, b1_ref, wh_ref, bh_ref, wl_ref, bl_ref, o_ref):
    # x_ref: (1, 1, TB) lane-dense batch tile; activations are kept transposed,
    # batch-along-lanes: h has shape (W, TB).
    x_row = x_ref[0]                                            # (1, TB)

    # Layer 0 (in_features == 1): rank-1 broadcast on the VPU, no MXU.
    h = jnp.maximum(w1_ref[...] * x_row + b1_ref[...], 0.0)     # (W,1)*(1,TB) -> (W,TB)

    # Hidden layers: (W, W) @ (W, TB) on the MXU, unrolled (depth is static).
    # Kept in f32: bf16 weights/activations would cut MXU cadence on v6e/v7x
    # and halve activation VMEM, but is borderline for the 1e-4 tolerance at
    # depth>2, and this kernel is step/DMA-bound, not MXU-bound, at W=32.
    n_hidden = wh_ref.shape[0]
    for i in range(n_hidden):
        h = jnp.dot(wh_ref[i], h, preferred_element_type=jnp.float32)
        h = jnp.maximum(h + bh_ref[i], 0.0)

    # Last layer (out_features == 1, no ReLU): elementwise multiply + sublane
    # reduce (VPU/XLU) instead of a degenerate N=1 MXU matmul. bl is an SMEM
    # scalar broadcast (free).
    out_row = jnp.sum(wl_ref[...] * h, axis=0, keepdims=True) + bl_ref[0, 0]  # (1, TB)
    o_ref[0] = out_row


def _choose_tile(n, tb_max=4096):
    """Lane-aligned (multiple of 128) batch tile.

    Caps at tb_max but never exceeds ~half the batch, so n_tiles >= 2 whenever
    N > 128 (the batch grid axis is "parallel": both v7x TensorCores stay busy).
    For N that is a multiple of 128 this usually divides N exactly, avoiding
    the host-side pad/slice HBM round-trip.
    """
    half = -(-n // 2)                       # cdiv(n, 2)
    tb = ((half + 127) // 128) * 128        # round up to lane width
    return max(128, min(tb_max, tb))


def relunet_forward(x, params, *, tb=None):
    """x: (N, 1) f32.  params: (w1, b1, wh, bh, wl, bl) with shapes
    (W,1), (W,1), (D-1,W,W), (D-1,W,1), (W,1), (1,1)."""
    w1, b1, wh, bh, wl, bl = params
    n = x.shape[0]
    width = w1.shape[0]
    n_hidden = wh.shape[0]
    assert n_hidden >= 1, "kernel assumes depth >= 2 (at least one Linear(W, W) layer)"

    if tb is None:
        tb = _choose_tile(n)
    assert tb % 128 == 0, "batch tile must be lane-aligned (multiple of 128)"

    n_tiles = pl.cdiv(n, tb)
    n_pad = n_tiles * tb

    # Pad batch to a tile multiple and lay it out lane-dense: (n_tiles, 1, TB).
    # (_choose_tile usually makes n_pad == n, so the pad/slice is a no-op.)
    x_flat = x.reshape(n)
    if n_pad != n:
        x_flat = jnp.pad(x_flat, (0, n_pad - n))
    x_tiles = x_flat.reshape(n_tiles, 1, tb)

    out_tiles = pl.pallas_call(
        relunet_kernel,
        out_shape=jax.ShapeDtypeStruct((n_tiles, 1, tb), jnp.float32),
        grid_spec=pltpu.PrefetchScalarGridSpec(
            num_scalar_prefetch=0,
            grid=(n_tiles,),
            in_specs=[
                pl.BlockSpec((1, 1, tb), lambda i: (i, 0, 0)),               # x tile
                pl.BlockSpec((width, 1), lambda i: (0, 0)),                  # w1
                pl.BlockSpec((width, 1), lambda i: (0, 0)),                  # b1
                pl.BlockSpec((n_hidden, width, width), lambda i: (0, 0, 0)),  # hidden W
                pl.BlockSpec((n_hidden, width, 1), lambda i: (0, 0, 0)),      # hidden b
                pl.BlockSpec((width, 1), lambda i: (0, 0)),                  # w_last
                pl.BlockSpec(memory_space=pltpu.MemorySpace.SMEM),           # b_last scalar
            ],
            out_specs=pl.BlockSpec((1, 1, tb), lambda i: (i, 0, 0)),
        ),
        compiler_params=pltpu.CompilerParams(
            dimension_semantics=("parallel",),
            # TODO(synk): at much larger width/depth, (a) single-buffer the
            # constant-index weight specs (pipeline_mode=pl.Buffered(1)) or hoist
            # them into a one-time VMEM scratch copy, and (b) on v7x (64 MiB VMEM)
            # if (D-1)*W*W*4B of hidden weights approaches ~half of VMEM, stream
            # one hidden layer per step: grid=(n_tiles, n_hidden), wh spec
            # (1, W, W) with index_map lambda i, l: (l, 0, 0), keep h in a
            # pltpu.VMEM((W, tb), f32) scratch, layer axis last and "arbitrary".
            # On v5e/v6e the cheaper fix is raising vmem_limit_bytes toward the
            # 128 MiB physical VMEM. Unnecessary at W=32 / depth=3.
        ),
    )(x_tiles, w1, b1, wh, bh, wl, bl)

    # Drop padding (if any) and restore the PyTorch (N, 1) output shape.
    out = out_tiles.reshape(n_pad, 1)
    return out if n_pad == n else out[:n]


def init_params(key, width, depth):
    """Deterministic synthetic parameters matching ReLUNet(width, depth)."""
    assert depth >= 2, "kernel assumes at least one hidden Linear(W, W) layer"
    ks = jax.random.split(key, 6)
    w1 = jax.random.normal(ks[0], (width, 1), jnp.float32) * 0.5       # layer_first.weight
    b1 = jax.random.normal(ks[1], (width, 1), jnp.float32) * 0.1
    wh = jax.random.normal(ks[2], (depth - 1, width, width), jnp.float32) * (
        1.0 / np.sqrt(width)
    )                                                                   # layers[i].weight
    bh = jax.random.normal(ks[3], (depth - 1, width, 1), jnp.float32) * 0.1
    wl = jax.random.normal(ks[4], (width, 1), jnp.float32) * (
        1.0 / np.sqrt(width)
    )                                                                   # layer_last.weight.T
    bl = jax.random.normal(ks[5], (1, 1), jnp.float32) * 0.1
    return w1, b1, wh, bh, wl, bl


def relunet_reference(x, params):
    """Pure-JAX reference with torch nn.Linear semantics: y = x @ W^T + b."""
    w1, b1, wh, bh, wl, bl = params
    h = jnp.maximum(x @ w1.T + b1.T, 0.0)
    for i in range(wh.shape[0]):
        h = jnp.maximum(h @ wh[i].T + bh[i].T, 0.0)
    return h @ wl + bl


if __name__ == "__main__":
    width, depth = 32, 3   # ReLUNet(width=32, depth=3) -> 2 hidden Linear(W,W) layers
    batch = 1000           # deliberately NOT a multiple of 128 (tests ragged-tail path)

    key = jax.random.PRNGKey(0)
    k_x, k_p = jax.random.split(key)
    x = jax.random.normal(k_x, (batch, 1), jnp.float32)
    params = init_params(k_p, width, depth)

    out = relunet_forward(x, params)          # adaptive tile: tb=512, n_tiles=2
    out = jax.block_until_ready(out)

    ref = relunet_reference(x, params)
    np.testing.assert_allclose(np.asarray(out), np.asarray(ref), rtol=1e-4, atol=1e-4)

    # Also exercise a larger, exactly-tiled batch (no pad/slice on the hot path).
    x_big = jax.random.normal(k_x, (8192, 1), jnp.float32)
    out_big = jax.block_until_ready(relunet_forward(x_big, params))   # tb=4096, 2 tiles
    ref_big = relunet_reference(x_big, params)
    np.testing.assert_allclose(np.asarray(out_big), np.asarray(ref_big),
                               rtol=1e-4, atol=1e-4)

    print("KERNEL_OK")
</pallas_src>

<mosaic_0001>
module attributes {stable_mosaic.version = 11 : i64} {
  func.func @relunet_kernel(%arg0: i32, %arg1: memref<1x1x512xf32, #tpu.memory_space<vmem>>, %arg2: memref<32x1xf32, #tpu.memory_space<vmem>>, %arg3: memref<32x1xf32, #tpu.memory_space<vmem>>, %arg4: memref<2x32x32xf32, #tpu.memory_space<vmem>>, %arg5: memref<2x32x1xf32, #tpu.memory_space<vmem>>, %arg6: memref<32x1xf32, #tpu.memory_space<vmem>>, %arg7: memref<1x1xf32, #tpu.memory_space<smem>>, %arg8: memref<1x1x512xf32, #tpu.memory_space<vmem>>) attributes {dimension_semantics = [#tpu.dimension_semantics<parallel>], iteration_bounds = array<i64: 2>, scalar_prefetch = 0 : i64, scratch_operands = 0 : i64, tpu.core_type = #tpu.core_type<tc>, window_params = [{transform_indices = @transform_0, window_bounds = array<i64: 1, 1, 512>}, {pipeline_mode = #tpu.pipeline_mode<synchronous>, transform_indices = @transform_1, window_bounds = array<i64: 32, 1>}, {pipeline_mode = #tpu.pipeline_mode<synchronous>, transform_indices = @transform_2, window_bounds = array<i64: 32, 1>}, {pipeline_mode = #tpu.pipeline_mode<synchronous>, transform_indices = @transform_3, window_bounds = array<i64: 2, 32, 32>}, {pipeline_mode = #tpu.pipeline_mode<synchronous>, transform_indices = @transform_4, window_bounds = array<i64: 2, 32, 1>}, {pipeline_mode = #tpu.pipeline_mode<synchronous>, transform_indices = @transform_5, window_bounds = array<i64: 32, 1>}, {transform_indices = @transform_6, window_bounds = array<i64: 1, 1>}, {transform_indices = @transform_7, window_bounds = array<i64: 1, 1, 512>}]} {
    %c0 = arith.constant 0 : index
    %c0_0 = arith.constant 0 : index
    %c0_1 = arith.constant 0 : index
    %0 = vector.load %arg1[%c0, %c0_0, %c0_1] : memref<1x1x512xf32, #tpu.memory_space<vmem>>, vector<1x1x512xf32>
    %1 = vector.shape_cast %0 : vector<1x1x512xf32> to vector<1x512xf32>
    %c0_2 = arith.constant 0 : index
    %c0_3 = arith.constant 0 : index
    %2 = vector.load %arg2[%c0_2, %c0_3] : memref<32x1xf32, #tpu.memory_space<vmem>>, vector<32x1xf32>
    %3 = vector.broadcast %2 : vector<32x1xf32> to vector<32x512xf32>
    %4 = vector.broadcast %1 : vector<1x512xf32> to vector<32x512xf32>
    %5 = arith.mulf %3, %4 : vector<32x512xf32>
    %c0_4 = arith.constant 0 : index
    %c0_5 = arith.constant 0 : index
    %6 = vector.load %arg3[%c0_4, %c0_5] : memref<32x1xf32, #tpu.memory_space<vmem>>, vector<32x1xf32>
    %7 = vector.broadcast %6 : vector<32x1xf32> to vector<32x512xf32>
    %8 = arith.addf %5, %7 : vector<32x512xf32>
    %cst = arith.constant 0.000000e+00 : f32
    %9 = vector.broadcast %cst : f32 to vector<32x512xf32>
    %10 = arith.maximumf %8, %9 : vector<32x512xf32>
    %c0_6 = arith.constant 0 : index
    %c0_7 = arith.constant 0 : index
    %c0_8 = arith.constant 0 : index
    %11 = vector.load %arg4[%c0_6, %c0_7, %c0_8] : memref<2x32x32xf32, #tpu.memory_space<vmem>>, vector<1x32x32xf32>
    %12 = vector.shape_cast %11 : vector<1x32x32xf32> to vector<32x32xf32>
    %cst_9 = arith.constant dense<0.000000e+00> : vector<32x512xf32>
    %13 = tpu.matmul %12, %10, %cst_9 {dimension_numbers = #tpu.dot_dimension_numbers<[1], [0], [0], [1], [0, 0, 1, 1], [], []>} : vector<32x32xf32>, vector<32x512xf32>, vector<32x512xf32> -> vector<32x512xf32>
    %c0_10 = arith.constant 0 : index
    %c0_11 = arith.constant 0 : index
    %c0_12 = arith.constant 0 : index
    %14 = vector.load %arg5[%c0_10, %c0_11, %c0_12] : memref<2x32x1xf32, #tpu.memory_space<vmem>>, vector<1x32x1xf32>
    %15 = vector.shape_cast %14 : vector<1x32x1xf32> to vector<32x1xf32>
    %16 = vector.broadcast %15 : vector<32x1xf32> to vector<32x512xf32>
    %17 = arith.addf %13, %16 : vector<32x512xf32>
    %cst_13 = arith.constant 0.000000e+00 : f32
    %18 = vector.broadcast %cst_13 : f32 to vector<32x512xf32>
    %19 = arith.maximumf %17, %18 : vector<32x512xf32>
    %c1 = arith.constant 1 : index
    %c0_14 = arith.constant 0 : index
    %c0_15 = arith.constant 0 : index
    %20 = vector.load %arg4[%c1, %c0_14, %c0_15] : memref<2x32x32xf32, #tpu.memory_space<vmem>>, vector<1x32x32xf32>
    %21 = vector.shape_cast %20 : vector<1x32x32xf32> to vector<32x32xf32>
    %cst_16 = arith.constant dense<0.000000e+00> : vector<32x512xf32>
    %22 = tpu.matmul %21, %19, %cst_16 {dimension_numbers = #tpu.dot_dimension_numbers<[1], [0], [0], [1], [0, 0, 1, 1], [], []>} : vector<32x32xf32>, vector<32x512xf32>, vector<32x512xf32> -> vector<32x512xf32>
    %c1_17 = arith.constant 1 : index
    %c0_18 = arith.constant 0 : index
    %c0_19 = arith.constant 0 : index
    %23 = vector.load %arg5[%c1_17, %c0_18, %c0_19] : memref<2x32x1xf32, #tpu.memory_space<vmem>>, vector<1x32x1xf32>
    %24 = vector.shape_cast %23 : vector<1x32x1xf32> to vector<32x1xf32>
    %25 = vector.broadcast %24 : vector<32x1xf32> to vector<32x512xf32>
    %26 = arith.addf %22, %25 : vector<32x512xf32>
    %cst_20 = arith.constant 0.000000e+00 : f32
    %27 = vector.broadcast %cst_20 : f32 to vector<32x512xf32>
    %28 = arith.maximumf %26, %27 : vector<32x512xf32>
    %c0_21 = arith.constant 0 : index
    %c0_22 = arith.constant 0 : index
    %29 = vector.load %arg6[%c0_21, %c0_22] : memref<32x1xf32, #tpu.memory_space<vmem>>, vector<32x1xf32>
    %30 = vector.broadcast %29 : vector<32x1xf32> to vector<32x512xf32>
    %31 = arith.mulf %30, %28 : vector<32x512xf32>
    %cst_23 = arith.constant dense<0.000000e+00> : vector<512xf32>
    %32 = vector.multi_reduction <add>, %31, %cst_23 [0] : vector<32x512xf32> to vector<512xf32>
    %33 = vector.shape_cast %32 : vector<512xf32> to vector<1x512xf32>
    %c0_24 = arith.constant 0 : index
    %c0_25 = arith.constant 0 : index
    %34 = memref.load %arg7[%c0_24, %c0_25] : memref<1x1xf32, #tpu.memory_space<smem>>
    %35 = vector.broadcast %34 : f32 to vector<1x512xf32>
    %36 = arith.addf %33, %35 : vector<1x512xf32>
    %c0_26 = arith.constant 0 : index
    %c0_27 = arith.constant 0 : index
    %c0_28 = arith.constant 0 : index
    %37 = vector.load %arg8[%c0_26, %c0_27, %c0_28] : memref<1x1x512xf32, #tpu.memory_space<vmem>>, vector<1x1x512xf32>
    %38 = vector.shape_cast %37 : vector<1x1x512xf32> to vector<1x512xf32>
    %39 = vector.shape_cast %36 : vector<1x512xf32> to vector<1x1x512xf32>
    tpu.vector_store %arg8[%c0_26, %c0_27, %c0_28], %39 {strides = array<i32>} : memref<1x1x512xf32, #tpu.memory_space<vmem>>, vector<1x1x512xf32>,
    return
  }
  func.func @transform_0(%arg0: i32) -> (i32, i32, i32) {
    %c0_i32 = arith.constant 0 : i32
    %c0_i32_0 = arith.constant 0 : i32
    %c0_i32_1 = arith.constant 0 : i32
    return %arg0, %c0_i32, %c0_i32_0 : i32, i32, i32
  }
  func.func @transform_1(%arg0: i32) -> (i32, i32) {
    %c0_i32 = arith.constant 0 : i32
    %c0_i32_0 = arith.constant 0 : i32
    %c0_i32_1 = arith.constant 0 : i32
    return %c0_i32, %c0_i32_0 : i32, i32
  }
  func.func @transform_2(%arg0: i32) -> (i32, i32) {
    %c0_i32 = arith.constant 0 : i32
    %c0_i32_0 = arith.constant 0 : i32
    %c0_i32_1 = arith.constant 0 : i32
    return %c0_i32, %c0_i32_0 : i32, i32
  }
  func.func @transform_3(%arg0: i32) -> (i32, i32, i32) {
    %c0_i32 = arith.constant 0 : i32
    %c0_i32_0 = arith.constant 0 : i32
    %c0_i32_1 = arith.constant 0 : i32
    %c0_i32_2 = arith.constant 0 : i32
    return %c0_i32, %c0_i32_0, %c0_i32_1 : i32, i32, i32
  }
  func.func @transform_4(%arg0: i32) -> (i32, i32, i32) {
    %c0_i32 = arith.constant 0 : i32
    %c0_i32_0 = arith.constant 0 : i32
    %c0_i32_1 = arith.constant 0 : i32
    %c0_i32_2 = arith.constant 0 : i32
    return %c0_i32, %c0_i32_0, %c0_i32_1 : i32, i32, i32
  }
  func.func @transform_5(%arg0: i32) -> (i32, i32) {
    %c0_i32 = arith.constant 0 : i32
    %c0_i32_0 = arith.constant 0 : i32
    %c0_i32_1 = arith.constant 0 : i32
    return %c0_i32, %c0_i32_0 : i32, i32
  }
  func.func @transform_6(%arg0: i32) -> (i32, i32) {
    %c0_i32 = arith.constant 0 : i32
    %c0_i32_0 = arith.constant 0 : i32
    %c0_i32_1 = arith.constant 0 : i32
    return %c0_i32, %c0_i32_0 : i32, i32
  }
  func.func @transform_7(%arg0: i32) -> (i32, i32, i32) {
    %c0_i32 = arith.constant 0 : i32
    %c0_i32_0 = arith.constant 0 : i32
    %c0_i32_1 = arith.constant 0 : i32
    return %arg0, %c0_i32, %c0_i32_0 : i32, i32, i32
  }
}

</mosaic_0001>

<bundles_post_ra>
// kernel: tpu_custom_call.1
= control target key start
LH: loop header
LB: loop body
LE: loop exit
PB: predicated region body
PF: predicated region fallthrough
CT: control target
= control target key end

     0   :  { %s1508_s0 = inlined_call_operand.vmem [shape: f32[2,1,512], index: 0, kind: input, shape index: {}]   ;;  %s1509_s1 = inlined_call_operand.vmem [shape: f32[32,1], index: 1, kind: input, shape index: {}]   ;;  %s1510_s2 = inlined_call_operand.vmem [shape: f32[32,1], index: 2, kind: input, shape index: {}]   ;;  %s1511_s3 = inlined_call_operand.vmem [shape: f32[2,32,32], index: 3, kind: input, shape index: {}]   ;;  %s1512_s4 = inlined_call_operand.vmem [shape: f32[2,32,1], index: 4, kind: input, shape index: {}]   ;;  %s1513_s5 = inlined_call_operand.vmem [shape: f32[32,1], index: 5, kind: input, shape index: {}]   ;;  %s1514_s6 = inlined_call_operand.<no memory space> [shape: f32[1,1], index: 6, kind: input, shape index: {}]   ;;  %s1515_s7 = inlined_call_operand.hbm [shape: f32[2,1,512], index: 7, kind: output, shape index: {}]  }
   0x1   :  { %12 = sst [smem:[#allocation2]] %s1514_s6 }
   0x2   :  { %13 = vsyncpa [#allocation4], 0 }
   0x3   :  { %15 = vsyncpa [#allocation4 + $0x1], 0  ;;  %s1277_s26 = smov 0   ;;  %s1279_s27 = smov 0  }
   0x4   :  { %s1281_s28 = smov 0   ;;  %s1283_s29 = smov 0  }
   0x5 LB: > { %s1298_s6 = sadd.s32 4294967295, %s1228_s29   ;;  %s1054_s30 = sadd.s32 4294967294, %s1228_s29   ;;  %s1228_s29 = sphi %s1283_s29, %s1521_s29   ;;  %s1224_s28 = sphi %s1281_s28, %s1520_s28   ;;  %s1220_s27 = sphi %s1279_s27, %s1519_s27   ;;  %s1216_s26 = sphi %s1277_s26, %s1518_s26  }
   0x6   : > { %s1302_s8 = sadd.s32 1, %s1228_s29   ;;  %s180_s9 = sadd.s32 1, %s1224_s28 }
   0x7   : > { %s177_s10 = ssub.s32 %s1228_s29, %s1302_s8  ;;  %p190_p0 = scmp.ne.s32.totalorder %s1224_s28, %s1220_s27 }
   0x8   : > { %p178_p1 = scmp.eq.s32.totalorder %s177_s10, 0  ;;  %p191_p2 = scmp.eq.s32.totalorder %s1298_s6, 1 }
   0x9   : > { %p196_p3 = scmp.ne.s32.totalorder %s1220_s27, %s1216_s26  ;;  %p197_p4 = scmp.eq.s32.totalorder %s1054_s30, 1 }
   0xa   : > { %s1313_s11 = scalar_select %p178_p1, %s1224_s28, %s180_s9  }
   0xb   : > { %p1315_p5 = por %p191_p2, %p190_p0  ;;  %p1319_p6 = por %p197_p4, %p196_p3 }
   0xc   : > { %p1057_p7 = scmp.ge.s32.totalorder %s1228_s29, 1  ;;  %p240_p8 = scmp.lt.s32.totalorder %s1228_s29, 3 }
   0xe   : > { %p241_p9 = pnand %p1057_p7, %p240_p8 }
   0xf   : > { %v337_v0 = vld [vmem:[%s1510_s2] sm:$0xff] (!%p241_p9)  ;;  %v1230_v2 = vmov (!%p241_p9), 0   ;;  %v338_v3 = vld [vmem:[%s1510_s2 + $0x8] sm:$0xff] (!%p241_p9)  ;;  %v279_v5 = vld [vmem:[%s1509_s1 + $0x18] sm:$0xff] (!%p241_p9)  ;;  %v1231_v15 = vmov (!%p241_p9), 0.0   ;;  %p271_p10 = scmp.lt.s32.totalorder (!%p241_p9), %s1298_s6, 1  ;;  %v301_v22 = vlaneseq (!%p241_p9) }
  0x10   : > { %244 = sbr.rel (%p241_p9) target bundleno = 672 (0x2a0), region = 48  ;;  %v276_v1 = vld [vmem:[%s1509_s1] sm:$0xff] (!%p241_p9)  ;;  %1165 = vset.pattern.permute.xlu1 (!%p241_p9), %v1230_v2  ;;  %1164 = vset.pattern.permute.xlu0 (!%p241_p9), %v1230_v2  ;;  %v277_v4 = vld [vmem:[%s1509_s1 + $0x8] sm:$0xff] (!%p241_p9)  ;;  %v278_v6 = vld [vmem:[%s1509_s1 + $0x10] sm:$0xff] (!%p241_p9)  ;;  %vm421_vm0 = vcmask (!%p241_p9), 261120   ;;  %s940_s15 = sld [smem:[#allocation2]] (!%p241_p9) }
  0x11   : > { %343 = vperm.xlu1 (!%p241_p9), %1165, %v337_v0   ;;  %282 = vperm.xlu0 (!%p241_p9), %1164, %v276_v1   ;;  %v340_v7 = vld [vmem:[%s1510_s2 + $0x18] sm:$0xff] (!%p241_p9)  ;;  %v339_v8 = vld [vmem:[%s1510_s2 + $0x10] sm:$0xff] (!%p241_p9)  ;;  %v398_v9 = vld [vmem:[%s1512_s4 + $0x8] sm:$0xff] (!%p241_p9)  ;;  %v1390_v23 = vshrl.u32 (!%p241_p9), %v301_v22, 7  ;;  %s268_s16 = sand.u32 (!%p241_p9), 1, %s1220_s27   ;;  %s1089_s18 = sshll.u32 (!%p241_p9), %s1298_s6, 6 }
  0x12   : > { %v397_v10 = vld [vmem:[%s1512_s4] sm:$0xff] (!%p241_p9)  ;;  %v400_v11 = vld [vmem:[%s1512_s4 + $0x18] sm:$0xff] (!%p241_p9)  ;;  %v399_v12 = vld [vmem:[%s1512_s4 + $0x10] sm:$0xff] (!%p241_p9)  ;;  %498 = vmatprep.mubr.f32.mxu0 (!%p241_p9), %v1231_v15  ;;  %587 = vmatprep.mubr.f32.mxu1 (!%p241_p9), %v1231_v15  ;;  %s1058_s17 = sshll.u32 (!%p241_p9), %s268_s16, 2  ;;  %vm977_vm1 = vcmp.lt.s32.totalorder (!%p241_p9), %v301_v22, 512  ;;  %s1466_s23 = scalar_lea.hbm (!%p241_p9), %s1515_s7, %s1089_s18 }
  0x13   : > { %v1073_v13 = vld [vmem:[%s1512_s4 + $0x28] sm:$0xff] (!%p241_p9)  ;;  %v1072_v14 = vld [vmem:[%s1512_s4 + $0x20] sm:$0xff] (!%p241_p9)  ;;  %v1075_v16 = vld [vmem:[%s1512_s4 + $0x38] sm:$0xff] (!%p241_p9)  ;;  %v303_v24 = vsub.s32 (!%p241_p9), 0, %v1390_v23  ;;  %v311_v25 = vsub.s32 (!%p241_p9), 2, %v1390_v23  ;;  %v307_v26 = vsub.s32 (!%p241_p9), 1, %v1390_v23 }
  0x14   : > { %v1074_v17 = vld [vmem:[%s1512_s4 + $0x30] sm:$0xff] (!%p241_p9)  ;;  %v865_v18 = vld [vmem:[%s1513_s5 + $0x8] sm:$0xff] (!%p241_p9)  ;;  %v864_v19 = vld [vmem:[%s1513_s5] sm:$0xff] (!%p241_p9)  ;;  %v315_v27 = vsub.s32 (!%p241_p9), 3, %v1390_v23  ;;  %s270_s19 = scalar_lea.vmem (!%p241_p9), [#allocation3], %s1058_s17 }
  0x15   : > { %348 = vperm.xlu1 (!%p241_p9), %1165, %v338_v3   ;;  %287 = vperm.xlu0 (!%p241_p9), %1164, %v277_v4   ;;  %v867_v20 = vld [vmem:[%s1513_s5 + $0x18] sm:$0xff] (!%p241_p9)  ;;  %v866_v21 = vld [vmem:[%s1513_s5 + $0x10] sm:$0xff] (!%p241_p9)  ;;  %s995_s20 = sshll.u32 (!%p241_p9), %s270_s19, 4  ;;  %s1468_s20 = int_to_ptr.vmem [resolvable:$true] %s995_s20 }
  0x17   : > { %s272_s24 = scalar_select %p271_p10, %s1298_s6, 1 }
  0x18   : > { %s1233_s6 = smov [#allocation3]  }
  0x19   : > { %297 = vperm.xlu1 %1165, %v279_v5   ;;  %292 = vperm.xlu0 %1164, %v278_v6   ;;  %s1059_s25 = sshll.u32 %s272_s24, 2  ;;  %s981_s24 = scalar_lea.sflag [#allocation4], %s268_s16 }
  0x1a   : > { %s274_s10 = scalar_lea.vmem %s1508_s0, %s1059_s25  ;;  %s1166_s25 = scalar_lea.vmem %s1468_s20, 64 }
  0x1b   : > { %v275_v28 = vld [vmem:[%s274_s10] sm:$0xf]  ;;  %p1167_p11 = scmp.ne.s32.totalorder %s1468_s20, %s1166_s25  ;;  %s1170_s30 = sshll.u32 %s1233_s6, 4  ;;  %s1171_s30 = int_to_ptr.vmem [resolvable:$false] %s1170_s30 }
  0x1c   : > { %v304_v29 = vrot.slane %v275_v28, %v303_v24  ;;  %v312_v30 = vrot.slane %v275_v28, %v311_v25  ;;  %v308_v31 = vrot.slane %v275_v28, %v307_v26  ;;  %v316_v32 = vrot.slane %v275_v28, %v315_v27  ;;  %s1172_s9 = scalar_lea.vmem %s1171_s30, 128  ;;  %p1173_p0 = scmp.lt.s32.totalorder %s1468_s20, %s1171_s30 }
  0x1d   : > { %358 = vperm.xlu1 %1165, %v340_v7   ;;  %353 = vperm.xlu0 %1164, %v339_v8   ;;  %p1168_p12 = pnand %p1167_p11, %p1315_p5  ;;  %p1174_p1 = scmp.lt.s32.totalorder %s1172_s9, %s1166_s25 }
  0x1f   : > { %p1169_p13 = pneg %p1168_p12  ;;  %p1175_p2 = por %p1174_p1, %p1173_p0 }
  0x21   : > { %408 = vperm.xlu1 %1165, %v398_v9   ;;  %403 = vperm.xlu0 %1164, %v397_v10   ;;  %p1176_p3 = pnand %p1175_p2, %p1169_p13 }
  0x25   : > { %418 = vperm.xlu1 %1165, %v400_v11   ;;  %413 = vperm.xlu0 %1164, %v399_v12  }
  0x29   : > { %645 = vperm.xlu1 %1165, %v1073_v13   ;;  %640 = vperm.xlu0 %1164, %v1072_v14  }
  0x2d   : > { %655 = vperm.xlu1 %1165, %v1075_v16   ;;  %650 = vperm.xlu0 %1164, %v1074_v17  }
  0x31   : > { %875 = vperm.xlu1 %1165, %v865_v18   ;;  %870 = vperm.xlu0 %1164, %v864_v19  }
  0x35   : > { %885 = vperm.xlu1 %1165, %v867_v20   ;;  %880 = vperm.xlu0 %1164, %v866_v21  }
  0x90   : > { %v344_v33 = vpop.permute.xlu1 %343  ;;  %v283_v34 = vpop.permute.xlu0 %282 }
  0x91   : > { %v321_v35 = vmul.f32 %v304_v29, %v283_v34  ;;  %v323_v36 = vmul.f32 %v312_v30, %v283_v34  ;;  %v322_v37 = vmul.f32 %v308_v31, %v283_v34  ;;  %v324_v38 = vmul.f32 %v316_v32, %v283_v34 }
  0x93   : > { %v362_v41 = vadd.f32 %v344_v33, %v322_v37  ;;  %v364_v42 = vadd.f32 %v344_v33, %v324_v38  ;;  %v361_v43 = vadd.f32 %v344_v33, %v321_v35  ;;  %v363_v47 = vadd.f32 %v344_v33, %v323_v36  ;;  %v393_v36 = vld [vmem:[%s1511_s3] sm:$0xff]  ;;  %v394_v37 = vld [vmem:[%s1511_s3 + $0x8] sm:$0xff]  ;;  %v395_v38 = vld [vmem:[%s1511_s3 + $0x10] sm:$0xff] }
  0x94   : > { %v349_v39 = vpop.permute.xlu1 %348  ;;  %v288_v40 = vpop.permute.xlu0 %287 }
  0x95   : > { %v325_v44 = vmul.f32 %v304_v29, %v288_v40  ;;  %v327_v45 = vmul.f32 %v312_v30, %v288_v40  ;;  %v326_v46 = vmul.f32 %v308_v31, %v288_v40  ;;  %v328_v48 = vmul.f32 %v316_v32, %v288_v40 }
  0x96   : > { %v378_v55 = vmax.f32 %v362_v41, 0.0  ;;  %v380_v56 = vmax.f32 %v364_v42, 0.0  ;;  %v377_v57 = vmax.f32 %v361_v43, 0.0  ;;  %v379_v58 = vmax.f32 %v363_v47, 0.0 }
  0x97   : > { %v366_v49 = vadd.f32 %v349_v39, %v326_v46  ;;  %v365_v50 = vadd.f32 %v349_v39, %v325_v44  ;;  %v367_v51 = vadd.f32 %v349_v39, %v327_v45  ;;  %v368_v54 = vadd.f32 %v349_v39, %v328_v48  ;;  %v396_v39 = vld [vmem:[%s1511_s3 + $0x18] sm:$0xff] }
  0x98   : > { %v298_v52 = vpop.permute.xlu1 %297  ;;  %v293_v53 = vpop.permute.xlu0 %292 }
  0x99   : > { %v333_v59 = vmul.f32 %v304_v29, %v298_v52  ;;  %v334_v60 = vmul.f32 %v308_v31, %v298_v52  ;;  %v335_v61 = vmul.f32 %v312_v30, %v298_v52  ;;  %v336_v62 = vmul.f32 %v316_v32, %v298_v52 }
  0x9a   : > { %v382_v63 = vmax.f32 %v366_v49, 0.0  ;;  %v384_v0 = vmax.f32 %v368_v54, 0.0  ;;  %v381_v1 = vmax.f32 %v365_v50, 0.0  ;;  %v383_v2 = vmax.f32 %v367_v51, 0.0 }
  0x9b   : > { %v329_v3 = vmul.f32 %v304_v29, %v293_v53  ;;  %v330_v4 = vmul.f32 %v308_v31, %v293_v53  ;;  %v331_v5 = vmul.f32 %v312_v30, %v293_v53  ;;  %v332_v6 = vmul.f32 %v316_v32, %v293_v53 }
  0x9c   : > { %v359_v7 = vpop.permute.xlu1 %358  ;;  %v354_v8 = vpop.permute.xlu0 %353  ;;  %v1090_v18 = vpack.c.bf16 %v382_v63, %v378_v55  ;;  %v1098_v19 = vpack.c.bf16 %v384_v0, %v380_v56  ;;  %v1092_v20 = vpack.c.bf16 %v381_v1, %v377_v57  ;;  %v1100_v21 = vpack.c.bf16 %v383_v2, %v379_v58 }
  0x9d   : > { %v373_v9 = vadd.f32 %v359_v7, %v333_v59  ;;  %v374_v10 = vadd.f32 %v359_v7, %v334_v60  ;;  %v375_v11 = vadd.f32 %v359_v7, %v335_v61  ;;  %v376_v12 = vadd.f32 %v359_v7, %v336_v62 }
  0x9e   : > { %v369_v13 = vadd.f32 %v354_v8, %v329_v3  ;;  %v370_v14 = vadd.f32 %v354_v8, %v330_v4  ;;  %v371_v16 = vadd.f32 %v354_v8, %v331_v5  ;;  %v372_v17 = vadd.f32 %v354_v8, %v332_v6  ;;  %1091 = vmatprep.subr.bf16.mxu0 %v1090_v18 }
  0x9f   : > { %v390_v25 = vmax.f32 %v374_v10, 0.0  ;;  %v392_v27 = vmax.f32 %v376_v12, 0.0  ;;  %1099 = vmatprep.subr.bf16.mxu1 %v1098_v19  ;;  %v389_v29 = vmax.f32 %v373_v9, 0.0  ;;  %v391_v31 = vmax.f32 %v375_v11, 0.0  ;;  %1093 = vmatpush1.bf16.msra.mxu0 %v1092_v20 }
  0xa0   : > { %v386_v24 = vmax.f32 %v370_v14, 0.0  ;;  %v388_v26 = vmax.f32 %v372_v17, 0.0  ;;  %v385_v28 = vmax.f32 %v369_v13, 0.0  ;;  %v387_v30 = vmax.f32 %v371_v16, 0.0  ;;  %1101 = vmatpush1.bf16.msra.mxu1 %v1100_v21  ;;  %v404_v44 = vpop.permute.xlu0 %403  ;;  %v409_v45 = vpop.permute.xlu1 %408 }
  0xa2   : > { %v1094_v32 = vpack.c.bf16 %v390_v25, %v386_v24  ;;  %v1102_v33 = vpack.c.bf16 %v392_v27, %v388_v26  ;;  %v1096_v34 = vpack.c.bf16 %v389_v29, %v385_v28  ;;  %v1104_v35 = vpack.c.bf16 %v391_v31, %v387_v30 }
  0xa4   : > { %1095 = vmatprep.subr.bf16.mxu0 %v1094_v32  ;;  %1103 = vmatprep.subr.bf16.mxu1 %v1102_v33  ;;  %v414_v8 = vpop.permute.xlu0 %413  ;;  %v419_v11 = vpop.permute.xlu1 %418 }
  0xa5   : > { %1097 = vmatpush1.bf16.msra.mxu0 %v1096_v34  ;;  %1105 = vmatpush1.bf16.msra.mxu1 %v1104_v35 }
  0xa8   : > { %1060 = vmatmul.mubr.msk.f32.vlgmr.msra.gmra.mrb[0].mxu0 %vm421_vm0, %v393_v36  ;;  %1064 = vmatmul.mubr.msk.f32.vlgmr.msra.gmra.mrb[0].mxu1 %vm421_vm0, %v393_v36 }
  0xa9   : > { %504 = vmatprep.mubr.f32.mxu0 %v1231_v15  ;;  %593 = vmatprep.mubr.f32.mxu1 %v1231_v15 }
  0xac   : > { %1061 = vmatmul.mubr.msk.f32.gmra.mrb[2].mxu0 %vm421_vm0, %v394_v37  ;;  %1065 = vmatmul.mubr.msk.f32.gmra.mrb[2].mxu1 %vm421_vm0, %v394_v37 }
  0xad   : > { %510 = vmatprep.mubr.f32.mxu0 %v1231_v15  ;;  %599 = vmatprep.mubr.f32.mxu1 %v1231_v15 }
  0xb0   : > { %1062 = vmatmul.mubr.msk.f32.gmra.mrb[4].mxu0 %vm421_vm0, %v395_v38  ;;  %1066 = vmatmul.mubr.msk.f32.gmra.mrb[4].mxu1 %vm421_vm0, %v395_v38 }
  0xb1   : > { %516 = vmatprep.mubr.f32.mxu0 %v1231_v15  ;;  %605 = vmatprep.mubr.f32.mxu1 %v1231_v15 }
  0xb4   : > { %1063 = vmatmul.mubr.msk.f32.gmra.mrb[6].mxu0 %vm421_vm0, %v396_v39  ;;  %1067 = vmatmul.mubr.msk.f32.gmra.mrb[6].mxu1 %vm421_vm0, %v396_v39  ;;  %v1068_v39 = vld [vmem:[%s1511_s3 + $0x20] sm:$0xff] }
  0xb5   : > { %734 = vmatprep.mubr.f32.mxu0 %v1231_v15  ;;  %823 = vmatprep.mubr.f32.mxu1 %v1231_v15 }
 0x17b   : > { %v500_v40 = vpop.f32.mrb[0].mxu0  ;;  %v589_v41 = vpop.f32.mrb[0].mxu1 }
 0x17c   : > { %v502_v42 = vpop.f32.mrb[1].mxu0  ;;  %v591_v43 = vpop.f32.mrb[1].mxu1  ;;  %v501_v46 = vadd.f32 %v500_v40, %v404_v44  ;;  %v590_v47 = vadd.f32 %v589_v41, %v404_v44  ;;  %v1069_v40 = vld [vmem:[%s1511_s3 + $0x28] sm:$0xff]  ;;  %v1070_v41 = vld [vmem:[%s1511_s3 + $0x30] sm:$0xff] }
 0x17d   : > { %v503_v48 = vadd.f32 %v502_v42, %v404_v44  ;;  %v592_v49 = vadd.f32 %v591_v43, %v404_v44  ;;  %v1071_v42 = vld [vmem:[%s1511_s3 + $0x38] sm:$0xff]  ;;  %v641_v43 = vpop.permute.xlu0 %640  ;;  %v646_v44 = vpop.permute.xlu1 %645 }
 0x17e   : > { %v612_v58 = vmax.f32 %v501_v46, 0.0  ;;  %v614_v59 = vmax.f32 %v590_v47, 0.0 }
 0x17f   : > { %v506_v50 = vpop.f32.mrb[2].mxu0  ;;  %v595_v51 = vpop.f32.mrb[2].mxu1  ;;  %v613_v62 = vmax.f32 %v503_v48, 0.0  ;;  %v615_v63 = vmax.f32 %v592_v49, 0.0 }
 0x180   : > { %v507_v52 = vadd.f32 %v506_v50, %v409_v45  ;;  %v596_v53 = vadd.f32 %v595_v51, %v409_v45  ;;  %v508_v54 = vpop.f32.mrb[3].mxu0  ;;  %v597_v55 = vpop.f32.mrb[3].mxu1 }
 0x181   : > { %v509_v56 = vadd.f32 %v508_v54, %v409_v45  ;;  %v598_v57 = vadd.f32 %v597_v55, %v409_v45  ;;  %v651_v45 = vpop.permute.xlu0 %650  ;;  %v1453_v46 = vpop.permute.xlu1 %655 }
 0x182   : > { %v616_v60 = vmax.f32 %v507_v52, 0.0  ;;  %v618_v61 = vmax.f32 %v596_v53, 0.0 }
 0x183   : > { %v617_v0 = vmax.f32 %v509_v56, 0.0  ;;  %v619_v1 = vmax.f32 %v598_v57, 0.0  ;;  %v512_v2 = vpop.f32.mrb[4].mxu0  ;;  %v601_v3 = vpop.f32.mrb[4].mxu1 }
 0x184   : > { %v1108_v4 = vpack.c.bf16 %v616_v60, %v612_v58  ;;  %v1116_v5 = vpack.c.bf16 %v618_v61, %v614_v59  ;;  %v514_v6 = vpop.f32.mrb[5].mxu0  ;;  %v603_v7 = vpop.f32.mrb[5].mxu1  ;;  %v513_v12 = vadd.f32 %v512_v2, %v414_v8  ;;  %v602_v13 = vadd.f32 %v601_v3, %v414_v8 }
 0x185   : > { %v1106_v9 = vpack.c.bf16 %v617_v0, %v613_v62  ;;  %v1114_v10 = vpack.c.bf16 %v619_v1, %v615_v63  ;;  %v515_v14 = vadd.f32 %v514_v6, %v414_v8  ;;  %v604_v16 = vadd.f32 %v603_v7, %v414_v8  ;;  %v871_v54 = vpop.permute.xlu0 %870  ;;  %v876_v3 = vpop.permute.xlu1 %875 }
 0x186   : > { %v620_v27 = vmax.f32 %v513_v12, 0.0  ;;  %v622_v28 = vmax.f32 %v602_v13, 0.0 }
 0x187   : > { %v518_v17 = vpop.f32.mrb[6].mxu0  ;;  %v607_v18 = vpop.f32.mrb[6].mxu1  ;;  %1107 = vmatprep.subr.bf16.mxu0 %v1106_v9  ;;  %1115 = vmatprep.subr.bf16.mxu1 %v1114_v10  ;;  %v621_v31 = vmax.f32 %v515_v14, 0.0  ;;  %v623_v32 = vmax.f32 %v604_v16, 0.0 }
 0x188   : > { %v519_v19 = vadd.f32 %v518_v17, %v419_v11  ;;  %v608_v20 = vadd.f32 %v607_v18, %v419_v11  ;;  %v520_v21 = vpop.f32.mrb[7].mxu0  ;;  %v609_v24 = vpop.f32.mrb[7].mxu1  ;;  %1109 = vmatpush1.bf16.msra.mxu0 %v1108_v4  ;;  %1117 = vmatpush1.bf16.msra.mxu1 %v1116_v5 }
 0x189   : > { %v521_v25 = vadd.f32 %v520_v21, %v419_v11  ;;  %v610_v26 = vadd.f32 %v609_v24, %v419_v11 }
 0x18a   : > { %v624_v29 = vmax.f32 %v519_v19, 0.0  ;;  %v626_v30 = vmax.f32 %v608_v20, 0.0 }
 0x18b   : > { %v625_v33 = vmax.f32 %v521_v25, 0.0  ;;  %v627_v34 = vmax.f32 %v610_v26, 0.0 }
 0x18c   : > { %v1112_v35 = vpack.c.bf16 %v624_v29, %v620_v27  ;;  %v1120_v36 = vpack.c.bf16 %v626_v30, %v622_v28  ;;  %v881_v27 = vpop.permute.xlu0 %880 }
 0x18d   : > { %v1110_v37 = vpack.c.bf16 %v625_v33, %v621_v31  ;;  %v1118_v38 = vpack.c.bf16 %v627_v34, %v623_v32 }
 0x18f   : > { %1111 = vmatprep.subr.bf16.mxu0 %v1110_v37  ;;  %1119 = vmatprep.subr.bf16.mxu1 %v1118_v38 }
 0x190   : > { %1113 = vmatpush1.bf16.msra.mxu0 %v1112_v35  ;;  %1121 = vmatpush1.bf16.msra.mxu1 %v1120_v36 }
 0x193   : > { %1076 = vmatmul.mubr.msk.f32.vlgmr.msra.gmra.mrb[8].mxu0 %vm421_vm0, %v1068_v39  ;;  %1080 = vmatmul.mubr.msk.f32.vlgmr.msra.gmra.mrb[8].mxu1 %vm421_vm0, %v1068_v39 }
 0x194   : > { %740 = vmatprep.mubr.f32.mxu0 %v1231_v15  ;;  %829 = vmatprep.mubr.f32.mxu1 %v1231_v15 }
 0x197   : > { %1077 = vmatmul.mubr.msk.f32.gmra.mrb[10].mxu0 %vm421_vm0, %v1069_v40  ;;  %1081 = vmatmul.mubr.msk.f32.gmra.mrb[10].mxu1 %vm421_vm0, %v1069_v40 }
 0x198   : > { %746 = vmatprep.mubr.f32.mxu0 %v1231_v15  ;;  %835 = vmatprep.mubr.f32.mxu1 %v1231_v15 }
 0x19b   : > { %1078 = vmatmul.mubr.msk.f32.gmra.mrb[12].mxu0 %vm421_vm0, %v1070_v41  ;;  %1082 = vmatmul.mubr.msk.f32.gmra.mrb[12].mxu1 %vm421_vm0, %v1070_v41 }
 0x19c   : > { %752 = vmatprep.mubr.f32.mxu0 %v1231_v15  ;;  %841 = vmatprep.mubr.f32.mxu1 %v1231_v15 }
 0x19f   : > { %1079 = vmatmul.mubr.msk.f32.gmra.mrb[14].mxu0 %vm421_vm0, %v1071_v42  ;;  %1083 = vmatmul.mubr.msk.f32.gmra.mrb[14].mxu1 %vm421_vm0, %v1071_v42 }
 0x266   : > { %v736_v47 = vpop.f32.mrb[8].mxu0  ;;  %v825_v48 = vpop.f32.mrb[8].mxu1 }
 0x267   : > { %v737_v49 = vadd.f32 %v736_v47, %v641_v43  ;;  %v826_v50 = vadd.f32 %v825_v48, %v641_v43  ;;  %v738_v51 = vpop.f32.mrb[9].mxu0  ;;  %v827_v52 = vpop.f32.mrb[9].mxu1 }
 0x268   : > { %v739_v15 = vadd.f32 %v738_v51, %v641_v43  ;;  %v828_v53 = vadd.f32 %v827_v52, %v641_v43 }
 0x269   : > { %v848_v55 = vmax.f32 %v737_v49, 0.0  ;;  %v850_v56 = vmax.f32 %v826_v50, 0.0 }
 0x26a   : > { %v849_v57 = vmax.f32 %v739_v15, 0.0  ;;  %v851_v58 = vmax.f32 %v828_v53, 0.0  ;;  %v742_v59 = vpop.f32.mrb[10].mxu0  ;;  %v831_v60 = vpop.f32.mrb[10].mxu1 }
 0x26b   : > { %v743_v61 = vadd.f32 %v742_v59, %v646_v44  ;;  %v832_v62 = vadd.f32 %v831_v60, %v646_v44  ;;  %v744_v63 = vpop.f32.mrb[11].mxu0  ;;  %v833_v0 = vpop.f32.mrb[11].mxu1  ;;  %v888_v4 = vmul.f32 %v871_v54, %v848_v55  ;;  %v890_v5 = vmul.f32 %v871_v54, %v850_v56 }
 0x26c   : > { %v745_v1 = vadd.f32 %v744_v63, %v646_v44  ;;  %v834_v2 = vadd.f32 %v833_v0, %v646_v44  ;;  %v889_v8 = vmul.f32 %v871_v54, %v849_v57  ;;  %v891_v9 = vmul.f32 %v871_v54, %v851_v58  ;;  %v886_v15 = vpop.permute.xlu1 %885 }
 0x26d   : > { %v852_v6 = vmax.f32 %v743_v61, 0.0  ;;  %v854_v7 = vmax.f32 %v832_v62, 0.0 }
 0x26e   : > { %v853_v10 = vmax.f32 %v745_v1, 0.0  ;;  %v855_v11 = vmax.f32 %v834_v2, 0.0  ;;  %v748_v12 = vpop.f32.mrb[12].mxu0  ;;  %v837_v13 = vpop.f32.mrb[12].mxu1 }
 0x26f   : > { %v892_v14 = vmul.f32 %v876_v3, %v852_v6  ;;  %v894_v16 = vmul.f32 %v876_v3, %v854_v7  ;;  %v749_v17 = vadd.f32 %v748_v12, %v651_v45  ;;  %v838_v18 = vadd.f32 %v837_v13, %v651_v45  ;;  %v750_v19 = vpop.f32.mrb[13].mxu0  ;;  %v839_v20 = vpop.f32.mrb[13].mxu1 }
 0x270   : > { %v893_v21 = vmul.f32 %v876_v3, %v853_v10  ;;  %v895_v24 = vmul.f32 %v876_v3, %v855_v11  ;;  %v751_v25 = vadd.f32 %v750_v19, %v651_v45  ;;  %v840_v26 = vadd.f32 %v839_v20, %v651_v45 }
 0x271   : > { %v904_v28 = vadd.f32 %v892_v14, %v888_v4  ;;  %v922_v29 = vadd.f32 %v894_v16, %v890_v5  ;;  %v856_v30 = vmax.f32 %v749_v17, 0.0  ;;  %v858_v31 = vmax.f32 %v838_v18, 0.0 }
 0x272   : > { %v913_v32 = vadd.f32 %v893_v21, %v889_v8  ;;  %v931_v33 = vadd.f32 %v895_v24, %v891_v9  ;;  %v857_v34 = vmax.f32 %v751_v25, 0.0  ;;  %v859_v35 = vmax.f32 %v840_v26, 0.0  ;;  %v754_v36 = vpop.f32.mrb[14].mxu0  ;;  %v843_v37 = vpop.f32.mrb[14].mxu1 }
 0x273   : > { %v896_v38 = vmul.f32 %v881_v27, %v856_v30  ;;  %v898_v39 = vmul.f32 %v881_v27, %v858_v31  ;;  %v755_v40 = vadd.f32 %v754_v36, %v1453_v46  ;;  %v844_v41 = vadd.f32 %v843_v37, %v1453_v46  ;;  %v756_v42 = vpop.f32.mrb[15].mxu0  ;;  %v845_v43 = vpop.f32.mrb[15].mxu1 }
 0x274   : > { %v897_v44 = vmul.f32 %v881_v27, %v857_v34  ;;  %v899_v45 = vmul.f32 %v881_v27, %v859_v35  ;;  %v757_v47 = vadd.f32 %v756_v42, %v1453_v46  ;;  %v846_v48 = vadd.f32 %v845_v43, %v1453_v46 }
 0x275   : > { %v905_v49 = vadd.f32 %v904_v28, %v896_v38  ;;  %v923_v50 = vadd.f32 %v922_v29, %v898_v39  ;;  %v860_v51 = vmax.f32 %v755_v40, 0.0  ;;  %v862_v52 = vmax.f32 %v844_v41, 0.0 }
 0x276   : > { %v914_v53 = vadd.f32 %v913_v32, %v897_v44  ;;  %v932_v54 = vadd.f32 %v931_v33, %v899_v45  ;;  %v861_v55 = vmax.f32 %v757_v47, 0.0  ;;  %v863_v56 = vmax.f32 %v846_v48, 0.0 }
 0x277   : > { %v900_v57 = vmul.f32 %v886_v15, %v860_v51  ;;  %v902_v58 = vmul.f32 %v886_v15, %v862_v52  ;;  %v1232_v12 = vmov 1966171168   ;;  %v941_v21 = vstv %s940_s15 }
 0x278   : > { %v901_v59 = vmul.f32 %v886_v15, %v861_v55  ;;  %v903_v60 = vmul.f32 %v886_v15, %v863_v56  ;;  %v953_v13 = vunpack.c.l.s4 %v1232_v12 }
 0x279   : > { %v906_v61 = vadd.f32 %v905_v49, %v900_v57  ;;  %v924_v62 = vadd.f32 %v923_v50, %v902_v58 }
 0x27a   : > { %v915_v63 = vadd.f32 %v914_v53, %v901_v59  ;;  %v933_v0 = vadd.f32 %v932_v54, %v903_v60  ;;  %v954_v26 = vunpack.c.0.s8 %v953_v13 }
 0x27b   : > { %v907_v1 = vrot.slane %v906_v61, 4  ;;  %v925_v2 = vrot.slane %v924_v62, 4 }
 0x27c   : > { %v916_v46 = vrot.slane %v915_v63, 4  ;;  %v934_v3 = vrot.slane %v933_v0, 4  ;;  %v957_v35 = vsub.s32 %v954_v26, %v1390_v23 }
 0x27d   : > { %v908_v4 = vadd.f32 %v907_v1, %v906_v61  ;;  %v926_v5 = vadd.f32 %v925_v2, %v924_v62 }
 0x27e   : > { %v917_v6 = vadd.f32 %v916_v46, %v915_v63  ;;  %v935_v7 = vadd.f32 %v934_v3, %v933_v0 }
 0x27f   : > { %v909_v8 = vrot.slane %v908_v4, 2  ;;  %v927_v9 = vrot.slane %v926_v5, 2 }
 0x280   : > { %v918_v10 = vrot.slane %v917_v6, 2  ;;  %v936_v11 = vrot.slane %v935_v7, 2 }
 0x281   : > { %v910_v14 = vadd.f32 %v909_v8, %v908_v4  ;;  %v928_v16 = vadd.f32 %v927_v9, %v926_v5 }
 0x282   : > { %v919_v17 = vadd.f32 %v918_v10, %v917_v6  ;;  %v937_v18 = vadd.f32 %v936_v11, %v935_v7 }
 0x283   : > { %v911_v19 = vrot.slane %v910_v14, 1  ;;  %v929_v20 = vrot.slane %v928_v16, 1 }
 0x284   : > { %v920_v24 = vrot.slane %v919_v17, 1  ;;  %v938_v25 = vrot.slane %v937_v18, 1 }
 0x285   : > { %v912_v27 = vadd.f32 %v911_v19, %v910_v14  ;;  %v930_v28 = vadd.f32 %v929_v20, %v928_v16 }
 0x286   : > { %v921_v29 = vadd.f32 %v920_v24, %v919_v17  ;;  %v939_v30 = vadd.f32 %v938_v25, %v937_v18 }
 0x287   : > { %v942_v31 = vadd.f32 %v941_v21, %v912_v27  ;;  %v944_v32 = vadd.f32 %v941_v21, %v930_v28 }
 0x288   : > { %v943_v33 = vadd.f32 %v941_v21, %v921_v29  ;;  %v945_v34 = vadd.f32 %v941_v21, %v939_v30 }
 0x28a   : > { %v950_v36 = vcombine.low %v942_v31, %v943_v33  ;;  %v951_v37 = vcombine.low %v944_v32, %v945_v34 }
 0x28c   : > { %v958_v38 = vrot.slane %v950_v36, %v957_v35  ;;  %v965_v39 = vrot.slane %v951_v37, %v957_v35 }
 0x28e   : > { %v966_v40 = vcombine.low %v958_v38, %v965_v39 }
 0x290   : > { %v973_v41 = vrot.slane %v966_v40, %v957_v35 }
 0x292   : > { %979 = vst.msk [vmem:[%s270_s19] sm:$0xf] %vm977_vm1, %v973_v41 }
 0x293   : > { %1179 = shalt.err (!%p1176_p3)
}
 0x294   : > { %s1180_s10 = scalar_lea.hbm %s1466_s23, 64  ;;  %s1184_s16 = scalar_lea.hbm %s1515_s7, 128 }
 0x295   : > { %p1181_p4 = scmp.ne.s32.totalorder %s1466_s23, %s1180_s10  ;;  %p1185_p9 = scmp.lt.u32.totalorder %s1466_s23, %s1515_s7 }
 0x296   : > { %p1186_p10 = scmp.lt.u32.totalorder %s1184_s16, %s1180_s10  ;;  %p1188_p12 = scmp.lt.u32.totalorder %s1180_s10, %s1466_s23 }
 0x297   : > { %p1182_p7 = pnand %p1181_p4, %p1315_p5 }
 0x298   : > { %p1187_p11 = por %p1186_p10, %p1185_p9 }
 0x299   : > { %p1183_p8 = pneg %p1182_p7 }
 0x29a   : > { %p1189_p13 = por %p1188_p12, %p1187_p11 }
 0x29c   : > { %p1190_p0 = pnand %p1189_p13, %p1183_p8 }
 0x29e   : > { %1193 = shalt.err (!%p1190_p0)
}
 0x29f   : > { %1122 = dma.vmem_to_hbm [thread:$0]  (%p1315_p5), %s1468_s20, 64, %s1466_s23, %s981_s24  }
 0x2a0 PF: > { %p1128_p1 = scmp.ge.s32.totalorder %s1228_s29, 2  ;;  %s1007_s19 = sand.u32 1, %s1216_s26  }
 0x2a1   : > { %s1008_s21 = scalar_lea.sflag [#allocation4], %s1007_s19 }
 0x2a2   : > { %p1125_p2 = pnand %p1128_p1, %p1319_p6 }
 0x2a4   : > { %1211 = dma.done.wait (!%p1125_p2), %s1008_s21, 64  }
 0x2a5   : > { %1213 = vsyncadd (!%p1125_p2), %s1008_s21, 4294967232  ;;  %p18_p3 = scmp.ge.s32.totalorder %s1302_s8, 4   ;;  %s1518_s26 = smov %s1220_s27 }
 0x2a6   : > { %s1519_s27 = smov %s1224_s28  ;;  %s1520_s28 = smov %s1313_s11 }
 0x2a7   : > { %s1521_s29 = smov %s1302_s8  ;;  %20 = sbr.rel (!%p18_p3) target bundleno = 5 (0x5), region = 85 }
 0x2ae   :  { %1013 = vsyncpa [#allocation4], 1 }
 0x2af   :  { %1015 = vsyncpa [#allocation4 + $0x1], 1 }

</bundles_post_ra>
